<compile_context>
chip_gen: v7x
topology: tpu7x:2x2x1
jax: 0.10.0
libtpu: 0.0.40
codegen_flags: <defaults>
</compile_context>

<pallas_src>
import functools
import math
from types import SimpleNamespace

import jax
import jax.numpy as jnp
from jax.experimental import pallas as pl
from jax.experimental.pallas import tpu as pltpu


# bf16 gather matmul: one-hot is exact in bf16; only the gathered head features
# round (~1e-3 relative change to the L1/rot losses).  Set False for f32 parity.
_GATHER_MATMUL_BF16 = True


def _round_up(x, m):
    return ((x + m - 1) // m) * m


# --------------------------------------------------------------------------
# Heatmap loss: _sigmoid + CenterNet focal loss (or MSE), tiled reduction.
# --------------------------------------------------------------------------
_LOG_LO = math.log(1e-4)
_LOG_HI = math.log(1.0 - 1e-4)


def _hm_kernel(x_ref, gt_ref, o_ref, acc_ref, *, rows, hw, r_blk, c_blk, use_mse):
    i = pl.program_id(0)
    j = pl.program_id(1)
    n_j = pl.num_programs(1)

    @pl.when(j == 0)
    def _():
        acc_ref[0] = jnp.float32(0.0)
        acc_ref[1] = jnp.float32(0.0)

    x = x_ref[...].astype(jnp.float32)
    gt = gt_ref[...].astype(jnp.float32)

    valid = None
    if rows % r_blk != 0:
        r_io = jax.lax.broadcasted_iota(jnp.int32, (r_blk, c_blk), 0)
        valid = (i * r_blk + r_io) < rows
    if hw % c_blk != 0:
        c_io = jax.lax.broadcasted_iota(jnp.int32, (r_blk, c_blk), 1)
        vc = (j * c_blk + c_io) < hw
        valid = vc if valid is None else (valid & vc)

    # clamped sigmoid using a single exp (+ one log in the focal branch)
    xm = jnp.clip(x, -15.0, 15.0)
    t = jnp.exp(-xm)

    if use_mse:
        pred = jnp.clip(1.0 / (1.0 + t), 1e-4, 1.0 - 1e-4)
        per = (pred - gt) ** 2
        if valid is not None:
            per = jnp.where(valid, per, 0.0)
        s0 = jnp.sum(per)
        s1 = jnp.float32(0.0)
    else:
        # approx reciprocal runs on the EUP slot; the result only feeds the
        # focal (1-p)^2 / p^2 weights and is clipped to the CenterNet clamp.
        pred = jnp.clip(pl.reciprocal(1.0 + t, approx=True), 1e-4, 1.0 - 1e-4)
        lp1 = jnp.log(1.0 + t)                            # softplus(-x)
        logp = jnp.clip(-lp1, _LOG_LO, _LOG_HI)           # log(clamped sigmoid)
        log1mp = jnp.clip(-xm - lp1, _LOG_LO, _LOG_HI)    # log(clamped 1-sigmoid)
        pos = gt == 1.0
        pos_loss = logp * (1.0 - pred) ** 2
        neg_loss = log1mp * (pred * pred) * (1.0 - gt) ** 4
        total = jnp.where(pos, pos_loss, neg_loss)        # single-pass reduction
        npos = pos.astype(jnp.float32)
        if valid is not None:
            total = jnp.where(valid, total, 0.0)
            npos = jnp.where(valid, npos, 0.0)
        s0 = jnp.sum(total)
        s1 = jnp.sum(npos)

    acc_ref[0] += s0
    acc_ref[1] += s1

    @pl.when(j == n_j - 1)
    def _():
        row_io = jax.lax.broadcasted_iota(jnp.int32, (8, 128), 0)
        lane_io = jax.lax.broadcasted_iota(jnp.int32, (8, 128), 1)
        out = jnp.where((row_io == 0) & (lane_io == 0), acc_ref[0], 0.0)
        out = jnp.where((row_io == 0) & (lane_io == 1), acc_ref[1], out)
        o_ref[0] = out


def heatmap_loss(hm_logits, hm_gt, *, use_mse=False, num_stacks=1):
    B, C, H, W = hm_logits.shape
    rows, hw = B * C, H * W
    x = hm_logits.reshape(rows, hw)
    g = hm_gt.reshape(rows, hw)

    # Column blocking: lane-dense, single block unless hw is very large.
    if hw % 128 == 0 and hw > 32768:
        c_blk = 32768
    else:
        c_blk = hw

    # Row blocking: ~4 MiB per input block; keep >=2 row blocks when possible
    # so the "parallel" row axis can be split across TensorCores.
    itemsize = max(x.dtype.itemsize, g.dtype.itemsize)
    sub = 16 if min(x.dtype.itemsize, g.dtype.itemsize) < 4 else 8
    if rows <= sub:
        r_blk = rows
    else:
        target_rows = max(sub, (4 * 1024 * 1024) // max(c_blk * itemsize, 1))
        half = max(sub, (((rows + 1) // 2) // sub) * sub)
        r_blk = max(sub, min((target_rows // sub) * sub, half))
    n_r = pl.cdiv(rows, r_blk)
    n_j = pl.cdiv(hw, c_blk)

    blk_bytes = r_blk * c_blk * 4
    vmem_limit = int(min(100 * 1024 * 1024, max(16 * 1024 * 1024, 12 * blk_bytes)))

    part = pl.pallas_call(
        functools.partial(_hm_kernel, rows=rows, hw=hw, r_blk=r_blk,
                          c_blk=c_blk, use_mse=use_mse),
        out_shape=jax.ShapeDtypeStruct((n_r, 8, 128), jnp.float32),
        grid_spec=pltpu.PrefetchScalarGridSpec(
            num_scalar_prefetch=0,
            grid=(n_r, n_j),
            in_specs=[pl.BlockSpec((r_blk, c_blk), lambda i, j: (i, j)),
                      pl.BlockSpec((r_blk, c_blk), lambda i, j: (i, j))],
            out_specs=pl.BlockSpec((1, 8, 128), lambda i, j: (i, 0, 0)),
            scratch_shapes=[pltpu.SMEM((2,), jnp.float32)],
        ),
        compiler_params=pltpu.CompilerParams(
            dimension_semantics=("parallel", "arbitrary"),
            vmem_limit_bytes=vmem_limit),
    )(x, g)

    sums = jnp.sum(part[:, 0, :2], axis=0)
    total, npos = sums[0], sums[1]
    if use_mse:
        return total / float(rows * hw)
    # max(npos, num_stacks) reproduces the per-stack "num_pos == 0" branch when
    # stacks are folded into rows (npos is always a multiple of num_stacks).
    return -total / jnp.maximum(npos, float(num_stacks))


# --------------------------------------------------------------------------
# Fused gather losses (dep L1, dim L1, wh L1, off L1, BinRot) in ONE kernel.
# fdata rows: 0 reg_mask, 1 rot_mask, 2 dep, 3-5 dim, 6-7 wh, 8-9 reg,
#             10-11 rotres, 12-15 zero-pad.   idata rows: 0 ind, 1-2 rotbin.
# feat rows:  heads concatenated in gather-plan order, zero-padded to 16.
# --------------------------------------------------------------------------
def _fused_kernel(idata_ref, fdata_ref, feat_ref, out_ref, acc_ref, *,
                  k_valid, hw, t_hw, kp, c_pad, needs_mask, mm_dtype,
                  dep_off, dim_off, rot_off, wh_off, reg_off):
    c = pl.program_id(1)
    n_c = pl.num_programs(1)

    @pl.when(c == 0)
    def _():
        acc_ref[...] = jnp.zeros_like(acc_ref)

    idat = idata_ref[0]                                   # (8, kp) int32
    # Chunk-local one-hot: onehot[p, k] = (p == ind[k] - base).
    # An out-of-range `ind` simply gathers zeros (same behaviour as before).
    ind_rel = idat[0:1, :] - c * t_hw                     # (1, kp)
    p_io = jax.lax.broadcasted_iota(jnp.int32, (t_hw, kp), 0)
    onehot = (p_io == ind_rel).astype(mm_dtype)           # (t_hw, kp)

    f = feat_ref[0]                                       # (c_pad, t_hw)
    if needs_mask:
        # Only taken when t_hw does not divide hw: zero the OOB tail so stale
        # or NaN data cannot leak through 0 * NaN inside the matmul.
        cpos = c * t_hw + jax.lax.broadcasted_iota(jnp.int32, (c_pad, t_hw), 1)
        f = jnp.where(cpos < hw, f, jnp.zeros_like(f))

    acc_ref[...] += jnp.dot(f.astype(mm_dtype), onehot,
                            preferred_element_type=jnp.float32)

    @pl.when(c == n_c - 1)
    def _():
        g = acc_ref[...]                                  # (c_pad, kp) f32
        fdat = fdata_ref[0].astype(jnp.float32)           # (16, kp)
        reg_mask = fdat[0:1, :]
        rot_mask = fdat[1:2, :]
        lane = jax.lax.broadcasted_iota(jnp.int32, (1, kp), 1)
        valid = (lane < k_valid).astype(jnp.float32)

        def l1_sum(p, t, m):
            return jnp.sum(jnp.abs(p * m - t * m))

        zero = jnp.float32(0.0)
        dep_s = dim_s = wh_s = off_s = zero
        ce1 = ce2 = res1_s = cnt1 = res2_s = cnt2 = zero

        if dep_off is not None:
            p = g[dep_off:dep_off + 1, :]
            p = 1.0 / (jax.nn.sigmoid(p) + 1e-6) - 1.0
            dep_s = l1_sum(p, fdat[2:3, :], reg_mask)
        if dim_off is not None:
            dim_s = l1_sum(g[dim_off:dim_off + 3, :], fdat[3:6, :], reg_mask)
        if wh_off is not None:
            wh_s = l1_sum(g[wh_off:wh_off + 2, :], fdat[6:8, :], rot_mask)
        if reg_off is not None:
            off_s = l1_sum(g[reg_off:reg_off + 2, :], fdat[8:10, :], rot_mask)
        if rot_off is not None:
            rp = g[rot_off:rot_off + 8, :]
            b1 = idat[1:2, :]
            b2 = idat[2:3, :]
            a1 = fdat[10:11, :]
            a2 = fdat[11:12, :]

            def bin_ce(l0, l1, tb):
                l0m = l0 * rot_mask
                l1m = l1 * rot_mask
                mx = jnp.maximum(l0m, l1m)
                lse = mx + jnp.log(jnp.exp(l0m - mx) + jnp.exp(l1m - mx))
                sel = jnp.where(tb == 0, l0m, l1m)
                return jnp.sum((lse - sel) * valid)

            def smooth_l1(x, t):
                d = jnp.abs(x - t)
                return jnp.where(d < 1.0, 0.5 * d * d, d - 0.5)

            ce1 = bin_ce(rp[0:1, :], rp[1:2, :], b1)
            ce2 = bin_ce(rp[4:5, :], rp[5:6, :], b2)
            m1 = (b1 != 0).astype(jnp.float32)
            m2 = (b2 != 0).astype(jnp.float32)
            res1_s = jnp.sum((smooth_l1(rp[2:3, :], jnp.sin(a1))
                              + smooth_l1(rp[3:4, :], jnp.cos(a1))) * m1)
            cnt1 = jnp.sum(m1)
            res2_s = jnp.sum((smooth_l1(rp[6:7, :], jnp.sin(a2))
                              + smooth_l1(rp[7:8, :], jnp.cos(a2))) * m2)
            cnt2 = jnp.sum(m2)

        vals = (dep_s, dim_s, wh_s, off_s, ce1, ce2, res1_s, cnt1, res2_s, cnt2)
        row_io = jax.lax.broadcasted_iota(jnp.int32, (8, 128), 0)
        lane_io = jax.lax.broadcasted_iota(jnp.int32, (8, 128), 1)
        out = jnp.zeros((8, 128), jnp.float32)
        for i, v in enumerate(vals):
            out = jnp.where((row_io == 0) & (lane_io == i), v, out)
        out_ref[0] = out


def _pick_chunk(hw, budget):
    """Spatial chunk: hw itself if it fits, else the largest multiple-of-128
    divisor of hw within budget (no tail masking); else a plain multiple of 128
    (tail masked in the kernel)."""
    if hw <= budget:
        return hw
    if hw % 128 == 0:
        q = hw // 128
        best = 0
        for d in range(1, q + 1):
            if q % d == 0 and d * 128 <= budget:
                best = d
        if best:
            return best * 128
    return max(128, (budget // 128) * 128)


def fused_gather_losses(output, batch, opt, *, hw_chunk=8192):
    use_dep = opt.dep_weight > 0
    use_dim = opt.dim_weight > 0
    use_rot = opt.rot_weight > 0
    use_wh = bool(opt.reg_bbox) and opt.wh_weight > 0
    use_off = bool(opt.reg_offset) and opt.off_weight > 0

    zero = jnp.float32(0.0)
    losses = {'dep': zero, 'dim': zero, 'rot': zero, 'wh': zero, 'off': zero}

    heads = []
    if use_dep:
        heads.append(('dep', output['dep'], 1))
    if use_dim:
        heads.append(('dim', output['dim'], 3))
    if use_rot:
        heads.append(('rot', output['rot'], 8))
    if use_wh:
        heads.append(('wh', output['wh'], 2))
    if use_off:
        heads.append(('reg', output['reg'], 2))
    if not heads:
        return losses

    B, _, H, W = heads[0][1].shape
    hw = H * W
    K = batch['ind'].shape[1]
    kp = _round_up(max(K, 1), 128)

    # VMEM-aware budget (scaled by kp so the one-hot stays modest), then a
    # divisor-aligned chunk so tail masking is normally never executed.
    budget = max(128, ((hw_chunk * 128 // kp) // 128) * 128)
    t_hw = _pick_chunk(hw, budget)
    n_chunks = pl.cdiv(hw, t_hw)
    needs_mask = (hw % t_hw) != 0

    acc_off = {}
    off = 0
    for name, _, w in heads:
        acc_off[name] = off
        off += w
    C_PAD = 16
    feat_dtype = jnp.bfloat16 if _GATHER_MATMUL_BF16 else jnp.float32

    # Single concatenated feature stream in gather-plan order, padded to 16 ch.
    feat = jnp.concatenate([t.reshape(B, w, hw) for _, t, w in heads], axis=1)
    if off < C_PAD:
        feat = jnp.concatenate(
            [feat, jnp.zeros((B, C_PAD - off, hw), feat.dtype)], axis=1)
    feat = feat.astype(feat_dtype)

    def pad_lanes(x):
        if x.shape[-1] == kp:
            return x
        cfg = [(0, 0)] * (x.ndim - 1) + [(0, kp - x.shape[-1])]
        return jnp.pad(x, cfg)

    f32 = jnp.float32
    zeros1 = jnp.zeros((B, 1, K), f32)
    zeros2 = jnp.zeros((B, 2, K), f32)
    zeros3 = jnp.zeros((B, 3, K), f32)

    def tKC(x):  # (B, K, c) -> (B, c, K)
        return jnp.transpose(x.astype(f32), (0, 2, 1))

    reg_mask = (batch['reg_mask'].astype(f32)[:, None, :]
                if (use_dep or use_dim) else zeros1)
    rot_mask = (batch['rot_mask'].astype(f32)[:, None, :]
                if (use_rot or use_wh or use_off) else zeros1)
    dep_t = tKC(batch['dep']) if use_dep else zeros1
    dim_t = tKC(batch['dim']) if use_dim else zeros3
    wh_t = tKC(batch['wh']) if use_wh else zeros2
    reg_t = tKC(batch['reg']) if use_off else zeros2
    res_t = tKC(batch['rotres']) if use_rot else zeros2
    fdata = jnp.concatenate(
        [reg_mask, rot_mask, dep_t, dim_t, wh_t, reg_t, res_t,
         jnp.zeros((B, 4, K), f32)], axis=1)                  # (B, 16, K)
    fdata = pad_lanes(fdata)

    ind = batch['ind'].astype(jnp.int32)[:, None, :]          # (B, 1, K)
    rotbin = (jnp.transpose(batch['rotbin'].astype(jnp.int32), (0, 2, 1))
              if use_rot else jnp.zeros((B, 2, K), jnp.int32))
    idata = jnp.concatenate(
        [ind, rotbin, jnp.zeros((B, 5, K), jnp.int32)], axis=1)  # (B, 8, K)
    idata = pad_lanes(idata)

    kern = functools.partial(
        _fused_kernel,
        k_valid=K, hw=hw, t_hw=t_hw, kp=kp, c_pad=C_PAD,
        needs_mask=needs_mask, mm_dtype=feat_dtype,
        dep_off=acc_off.get('dep'), dim_off=acc_off.get('dim'),
        rot_off=acc_off.get('rot'), wh_off=acc_off.get('wh'),
        reg_off=acc_off.get('reg'))

    in_specs = [
        pl.BlockSpec((1, 8, kp), lambda b, c: (b, 0, 0)),
        pl.BlockSpec((1, 16, kp), lambda b, c: (b, 0, 0)),
        pl.BlockSpec((1, C_PAD, t_hw), lambda b, c: (b, 0, c)),
    ]

    # Right-size the VMEM request (feature double-buffer + one-hot temporaries
    # + accumulator), with 2x headroom, instead of a blanket 48 MiB.
    feat_itemsize = 2 if _GATHER_MATMUL_BF16 else 4
    vmem_need = (2 * C_PAD * t_hw * feat_itemsize
                 + t_hw * kp * (8 + feat_itemsize)
                 + C_PAD * kp * 4
                 + 2 * (8 + 16) * kp * 4
                 + 2 * 8 * 128 * 4)
    vmem_limit = int(min(100 * 1024 * 1024,
                         max(8 * 1024 * 1024, 2 * vmem_need)))

    part = pl.pallas_call(
        kern,
        out_shape=jax.ShapeDtypeStruct((B, 8, 128), jnp.float32),
        grid_spec=pltpu.PrefetchScalarGridSpec(
            num_scalar_prefetch=0,
            grid=(B, n_chunks),
            in_specs=in_specs,
            out_specs=pl.BlockSpec((1, 8, 128), lambda b, c: (b, 0, 0)),
            scratch_shapes=[pltpu.VMEM((C_PAD, kp), jnp.float32)],
        ),
        compiler_params=pltpu.CompilerParams(
            dimension_semantics=("parallel", "arbitrary"),
            vmem_limit_bytes=vmem_limit),
    )(idata, fdata, feat)

    v = jnp.sum(part[:, 0, :], axis=0)       # (128,) lane-packed partial sums
    n_obj = float(B * K)
    if use_dep:
        losses['dep'] = v[0] / (n_obj * 1.0)
    if use_dim:
        losses['dim'] = v[1] / (n_obj * 3.0)
    if use_wh:
        losses['wh'] = v[2] / (n_obj * 2.0)
    if use_off:
        losses['off'] = v[3] / (n_obj * 2.0)
    if use_rot:
        ce = (v[4] + v[5]) / n_obj
        r1 = jnp.where(v[7] > 0.0, v[6] / jnp.maximum(v[7], 1.0), 0.0)
        r2 = jnp.where(v[9] > 0.0, v[8] / jnp.maximum(v[9], 1.0), 0.0)
        losses['rot'] = ce + r1 + r2
    return losses


# --------------------------------------------------------------------------
# DddLoss forward
# --------------------------------------------------------------------------
def ddd_loss(outputs, batch, opt):
    S = int(opt.num_stacks)
    if S == 1:
        output = outputs[0]
        hm_gt = batch['hm']
        gbatch = batch
    else:
        # Fold stacks into the batch/row dimension: one pallas_call per loss
        # instead of num_stacks; the per-element normalisations absorb the
        # 1/num_stacks factor exactly (identical to the per-stack average).
        output = {k: jnp.concatenate([outputs[s][k] for s in range(S)], axis=0)
                  for k in outputs[0]}
        hm_gt = jnp.concatenate([batch['hm']] * S, axis=0)
        gbatch = {k: (v if k == 'hm' else jnp.concatenate([v] * S, axis=0))
                  for k, v in batch.items()}

    hm_loss = heatmap_loss(output['hm'], hm_gt, use_mse=opt.mse_loss,
                           num_stacks=S)
    # TODO(synk): opt.eval_oracle_dep path (gen_oracle_map numpy round-trip) not implemented.
    d = fused_gather_losses(output, gbatch, opt)
    dep_loss, dim_loss, rot_loss = d['dep'], d['dim'], d['rot']
    wh_loss, off_loss = d['wh'], d['off']

    loss = (opt.hm_weight * hm_loss + opt.dep_weight * dep_loss
            + opt.dim_weight * dim_loss + opt.rot_weight * rot_loss
            + opt.wh_weight * wh_loss + opt.off_weight * off_loss)
    loss_stats = {'loss': loss, 'hm_loss': hm_loss, 'dep_loss': dep_loss,
                  'dim_loss': dim_loss, 'rot_loss': rot_loss,
                  'wh_loss': wh_loss, 'off_loss': off_loss}
    return loss, loss_stats


# --------------------------------------------------------------------------
# Test data helpers + smoke test
# --------------------------------------------------------------------------
def make_example(key, B, num_classes, H, W, K):
    ks = jax.random.split(key, 16)
    outputs = [{
        'hm':  jax.random.normal(ks[0], (B, num_classes, H, W), jnp.float32),
        'dep': jax.random.normal(ks[1], (B, 1, H, W), jnp.float32),
        'dim': jax.random.normal(ks[2], (B, 3, H, W), jnp.float32),
        'rot': jax.random.normal(ks[3], (B, 8, H, W), jnp.float32),
        'wh':  jax.random.normal(ks[4], (B, 2, H, W), jnp.float32),
        'reg': jax.random.normal(ks[5], (B, 2, H, W), jnp.float32),
    }]
    hm_gt = jax.random.uniform(ks[6], (B, num_classes, H, W), jnp.float32, 0.0, 0.98)
    # a few exact peaks (positives) like CenterNet gaussian heatmaps
    hm_gt = hm_gt.at[0, 0, H // 4, W // 3].set(1.0)
    hm_gt = hm_gt.at[0, 1 % num_classes, H // 2, W // 2].set(1.0)
    hm_gt = hm_gt.at[(B - 1), num_classes - 1, H // 3, W - 2].set(1.0)
    batch = {
        'hm': hm_gt,
        'ind': jax.random.randint(ks[7], (B, K), 0, H * W, jnp.int32),
        'reg_mask': (jax.random.uniform(ks[8], (B, K)) > 0.3).astype(jnp.float32),
        'rot_mask': (jax.random.uniform(ks[9], (B, K)) > 0.3).astype(jnp.float32),
        'dep': jax.random.uniform(ks[10], (B, K, 1), jnp.float32, 1.0, 40.0),
        'dim': jax.random.uniform(ks[11], (B, K, 3), jnp.float32, 0.5, 4.0),
        'rotbin': jax.random.randint(ks[12], (B, K, 2), 0, 2, jnp.int32),
        'rotres': jax.random.uniform(ks[13], (B, K, 2), jnp.float32, -0.5, 0.5),
        'wh': jax.random.uniform(ks[14], (B, K, 2), jnp.float32, 1.0, 10.0),
        'reg': jax.random.uniform(ks[15], (B, K, 2), jnp.float32, 0.0, 1.0),
    }
    return outputs, batch


if __name__ == "__main__":
    opt = SimpleNamespace(num_stacks=1, mse_loss=False, eval_oracle_dep=False,
                          hm_weight=1.0, dep_weight=1.0, dim_weight=1.0,
                          rot_weight=1.0, wh_weight=0.1, off_weight=1.0,
                          reg_bbox=True, reg_offset=True)

    key = jax.random.PRNGKey(0)
    k1, k2, k3, k4, k5 = jax.random.split(key, 5)

    # 1) Small shapes: single spatial chunk / single heatmap block.
    outputs, batch = make_example(k1, B=2, num_classes=3, H=16, W=16, K=8)
    loss, stats = ddd_loss(outputs, batch, opt)
    loss = jax.block_until_ready(loss)
    jax.block_until_ready(stats)
    assert bool(jnp.isfinite(loss)), "non-finite loss (test 1)"

    # 2) Larger shapes: exercises multiple heatmap row-blocks (partial last
    #    block masking) with a single divisor-aligned gather chunk.
    outputs2, batch2 = make_example(k2, B=2, num_classes=5, H=80, W=80, K=12)
    loss2, stats2 = ddd_loss(outputs2, batch2, opt)
    loss2 = jax.block_until_ready(loss2)
    jax.block_until_ready(stats2)
    assert bool(jnp.isfinite(loss2)), "non-finite loss (test 2)"

    # 3) Multi-chunk gather accumulation (divisor-aligned: hw=6400, t_hw=640).
    d3 = fused_gather_losses(outputs2[0], batch2, opt, hw_chunk=1024)
    jax.block_until_ready(d3)
    assert all(bool(jnp.isfinite(v)) for v in d3.values()), "non-finite (test 3)"

    # 4) Fallback tail-mask path (hw=400 not a multiple of 128, chunk=256).
    outputs4, batch4 = make_example(k3, B=2, num_classes=3, H=20, W=20, K=4)
    d4 = fused_gather_losses(outputs4[0], batch4, opt, hw_chunk=256)
    jax.block_until_ready(d4)
    assert all(bool(jnp.isfinite(v)) for v in d4.values()), "non-finite (test 4)"

    # 5) num_stacks=2: stacks folded into the batch/row dimension.
    outputs5a, batch5 = make_example(k4, B=2, num_classes=3, H=16, W=16, K=8)
    outputs5b, _ = make_example(k5, B=2, num_classes=3, H=16, W=16, K=8)
    opt2 = SimpleNamespace(**{**vars(opt), 'num_stacks': 2})
    loss5, stats5 = ddd_loss([outputs5a[0], outputs5b[0]], batch5, opt2)
    loss5 = jax.block_until_ready(loss5)
    jax.block_until_ready(stats5)
    assert bool(jnp.isfinite(loss5)), "non-finite loss (test 5)"

    print("KERNEL_OK")
</pallas_src>

<mosaic_0001>
module attributes {stable_mosaic.version = 11 : i64} {
  func.func @_hm_kernel(%arg0: i32, %arg1: i32, %arg2: memref<6x256xf32, #tpu.memory_space<vmem>>, %arg3: memref<6x256xf32, #tpu.memory_space<vmem>>, %arg4: memref<1x8x128xf32, #tpu.memory_space<vmem>>, %arg5: memref<2xf32, #tpu.memory_space<smem>>) attributes {dimension_semantics = [#tpu.dimension_semantics<parallel>, #tpu.dimension_semantics<arbitrary>], iteration_bounds = array<i64: 1, 1>, scalar_prefetch = 0 : i64, scratch_operands = 1 : i64, tpu.core_type = #tpu.core_type<tc>, window_params = [{transform_indices = @transform_0, window_bounds = array<i64: 6, 256>}, {transform_indices = @transform_1, window_bounds = array<i64: 6, 256>}, {transform_indices = @transform_2, window_bounds = array<i64: 1, 8, 128>}]} {
    %c0_i32 = arith.constant 0 : i32
    %0 = arith.cmpi eq, %arg1, %c0_i32 : i32
    %1 = arith.extui %0 : i1 to i32
    %c0_i32_0 = arith.constant 0 : i32
    %2 = arith.cmpi ne, %1, %c0_i32_0 : i32
    scf.if %2 {
      %cst_26 = arith.constant 0.000000e+00 : f32
      %c0_27 = arith.constant 0 : index
      %68 = memref.load %arg5[%c0_27] : memref<2xf32, #tpu.memory_space<smem>>
      memref.store %cst_26, %arg5[%c0_27] : memref<2xf32, #tpu.memory_space<smem>>
      %cst_28 = arith.constant 0.000000e+00 : f32
      %c1_29 = arith.constant 1 : index
      %69 = memref.load %arg5[%c1_29] : memref<2xf32, #tpu.memory_space<smem>>
      memref.store %cst_28, %arg5[%c1_29] : memref<2xf32, #tpu.memory_space<smem>>
    } else {
    }
    %c0 = arith.constant 0 : index
    %c0_1 = arith.constant 0 : index
    %3 = vector.load %arg2[%c0, %c0_1] : memref<6x256xf32, #tpu.memory_space<vmem>>, vector<6x256xf32>
    %c0_2 = arith.constant 0 : index
    %c0_3 = arith.constant 0 : index
    %4 = vector.load %arg3[%c0_2, %c0_3] : memref<6x256xf32, #tpu.memory_space<vmem>>, vector<6x256xf32>
    %cst = arith.constant -1.500000e+01 : f32
    %cst_4 = arith.constant 1.500000e+01 : f32
    %5 = vector.broadcast %cst : f32 to vector<6x256xf32>
    %6 = arith.maximumf %5, %3 : vector<6x256xf32>
    %7 = vector.broadcast %cst_4 : f32 to vector<6x256xf32>
    %8 = arith.minimumf %7, %6 : vector<6x256xf32>
    %cst_5 = arith.constant 0.000000e+00 : f32
    %9 = vector.broadcast %cst_5 : f32 to vector<6x256xf32>
    %10 = arith.subf %9, %8 : vector<6x256xf32>
    %11 = math.exp %10 : vector<6x256xf32>
    %cst_6 = arith.constant 1.000000e+00 : f32
    %12 = vector.broadcast %cst_6 : f32 to vector<6x256xf32>
    %13 = arith.addf %12, %11 : vector<6x256xf32>
    %14 = tpu.reciprocal %13 {approx = true} : vector<6x256xf32> -> vector<6x256xf32>
    %cst_7 = arith.constant 9.99999974E-5 : f32
    %cst_8 = arith.constant 0.999899983 : f32
    %15 = vector.broadcast %cst_7 : f32 to vector<6x256xf32>
    %16 = arith.maximumf %15, %14 : vector<6x256xf32>
    %17 = vector.broadcast %cst_8 : f32 to vector<6x256xf32>
    %18 = arith.minimumf %17, %16 : vector<6x256xf32>
    %cst_9 = arith.constant 1.000000e+00 : f32
    %19 = vector.broadcast %cst_9 : f32 to vector<6x256xf32>
    %20 = arith.addf %19, %11 : vector<6x256xf32>
    %21 = math.log %20 : vector<6x256xf32>
    %cst_10 = arith.constant 0.000000e+00 : f32
    %22 = vector.broadcast %cst_10 : f32 to vector<6x256xf32>
    %23 = arith.subf %22, %21 : vector<6x256xf32>
    %cst_11 = arith.constant -9.21034049 : f32
    %cst_12 = arith.constant -1.000050e-04 : f32
    %24 = vector.broadcast %cst_11 : f32 to vector<6x256xf32>
    %25 = arith.maximumf %24, %23 : vector<6x256xf32>
    %26 = vector.broadcast %cst_12 : f32 to vector<6x256xf32>
    %27 = arith.minimumf %26, %25 : vector<6x256xf32>
    %cst_13 = arith.constant 0.000000e+00 : f32
    %28 = vector.broadcast %cst_13 : f32 to vector<6x256xf32>
    %29 = arith.subf %28, %8 : vector<6x256xf32>
    %30 = arith.subf %29, %21 : vector<6x256xf32>
    %cst_14 = arith.constant -9.21034049 : f32
    %cst_15 = arith.constant -1.000050e-04 : f32
    %31 = vector.broadcast %cst_14 : f32 to vector<6x256xf32>
    %32 = arith.maximumf %31, %30 : vector<6x256xf32>
    %33 = vector.broadcast %cst_15 : f32 to vector<6x256xf32>
    %34 = arith.minimumf %33, %32 : vector<6x256xf32>
    %cst_16 = arith.constant 1.000000e+00 : f32
    %35 = vector.broadcast %cst_16 : f32 to vector<6x256xf32>
    %36 = arith.cmpf oeq, %4, %35 : vector<6x256xf32>
    %cst_17 = arith.constant 1.000000e+00 : f32
    %37 = vector.broadcast %cst_17 : f32 to vector<6x256xf32>
    %38 = arith.subf %37, %18 : vector<6x256xf32>
    %39 = arith.mulf %38, %38 : vector<6x256xf32>
    %40 = arith.mulf %27, %39 : vector<6x256xf32>
    %41 = arith.mulf %18, %18 : vector<6x256xf32>
    %42 = arith.mulf %34, %41 : vector<6x256xf32>
    %cst_18 = arith.constant 1.000000e+00 : f32
    %43 = vector.broadcast %cst_18 : f32 to vector<6x256xf32>
    %44 = arith.subf %43, %4 : vector<6x256xf32>
    %45 = arith.mulf %44, %44 : vector<6x256xf32>
    %46 = arith.mulf %45, %45 : vector<6x256xf32>
    %47 = arith.mulf %42, %46 : vector<6x256xf32>
    %48 = arith.select %36, %40, %47 : vector<6x256xi1>, vector<6x256xf32>
    %49 = arith.extui %36 : vector<6x256xi1> to vector<6x256xi32>
    %50 = arith.sitofp %49 : vector<6x256xi32> to vector<6x256xf32>
    %51 = vector.shape_cast %48 : vector<6x256xf32> to vector<1x6x256xf32>
    %cst_19 = arith.constant dense<0.000000e+00> : vector<1xf32>
    %52 = vector.multi_reduction <add>, %51, %cst_19 [1, 2] : vector<1x6x256xf32> to vector<1xf32>
    %53 = vector.shape_cast %52 : vector<1xf32> to vector<1x1x1xf32>
    %54 = vector.extract %53[0, 0, 0] : f32 from vector<1x1x1xf32>
    %55 = vector.shape_cast %50 : vector<6x256xf32> to vector<1x6x256xf32>
    %cst_20 = arith.constant dense<0.000000e+00> : vector<1xf32>
    %56 = vector.multi_reduction <add>, %55, %cst_20 [1, 2] : vector<1x6x256xf32> to vector<1xf32>
    %57 = vector.shape_cast %56 : vector<1xf32> to vector<1x1x1xf32>
    %58 = vector.extract %57[0, 0, 0] : f32 from vector<1x1x1xf32>
    %c0_21 = arith.constant 0 : index
    %59 = memref.load %arg5[%c0_21] : memref<2xf32, #tpu.memory_space<smem>>
    %60 = arith.addf %59, %54 : f32
    %c0_22 = arith.constant 0 : index
    %61 = memref.load %arg5[%c0_22] : memref<2xf32, #tpu.memory_space<smem>>
    memref.store %60, %arg5[%c0_22] : memref<2xf32, #tpu.memory_space<smem>>
    %c1 = arith.constant 1 : index
    %62 = memref.load %arg5[%c1] : memref<2xf32, #tpu.memory_space<smem>>
    %63 = arith.addf %62, %58 : f32
    %c1_23 = arith.constant 1 : index
    %64 = memref.load %arg5[%c1_23] : memref<2xf32, #tpu.memory_space<smem>>
    memref.store %63, %arg5[%c1_23] : memref<2xf32, #tpu.memory_space<smem>>
    %c0_i32_24 = arith.constant 0 : i32
    %65 = arith.cmpi eq, %arg1, %c0_i32_24 : i32
    %66 = arith.extui %65 : i1 to i32
    %c0_i32_25 = arith.constant 0 : i32
    %67 = arith.cmpi ne, %66, %c0_i32_25 : i32
    scf.if %67 {
      %68 = tpu.iota {dimensions = array<i32: 0>} : vector<8x128xi32>
      %69 = tpu.iota {dimensions = array<i32: 1>} : vector<8x128xi32>
      %c0_i32_26 = arith.constant 0 : i32
      %70 = vector.broadcast %c0_i32_26 : i32 to vector<8x128xi32>
      %71 = arith.cmpi eq, %68, %70 : vector<8x128xi32>
      %c0_i32_27 = arith.constant 0 : i32
      %72 = vector.broadcast %c0_i32_27 : i32 to vector<8x128xi32>
      %73 = arith.cmpi eq, %69, %72 : vector<8x128xi32>
      %74 = arith.andi %71, %73 : vector<8x128xi1>
      %c0_28 = arith.constant 0 : index
      %75 = memref.load %arg5[%c0_28] : memref<2xf32, #tpu.memory_space<smem>>
      %cst_29 = arith.constant 0.000000e+00 : f32
      %76 = vector.broadcast %75 : f32 to vector<8x128xf32>
      %77 = vector.broadcast %cst_29 : f32 to vector<8x128xf32>
      %78 = arith.select %74, %76, %77 : vector<8x128xi1>, vector<8x128xf32>
      %c0_i32_30 = arith.constant 0 : i32
      %79 = vector.broadcast %c0_i32_30 : i32 to vector<8x128xi32>
      %80 = arith.cmpi eq, %68, %79 : vector<8x128xi32>
      %c1_i32 = arith.constant 1 : i32
      %81 = vector.broadcast %c1_i32 : i32 to vector<8x128xi32>
      %82 = arith.cmpi eq, %69, %81 : vector<8x128xi32>
      %83 = arith.andi %80, %82 : vector<8x128xi1>
      %c1_31 = arith.constant 1 : index
      %84 = memref.load %arg5[%c1_31] : memref<2xf32, #tpu.memory_space<smem>>
      %85 = vector.broadcast %84 : f32 to vector<8x128xf32>
      %86 = arith.select %83, %85, %78 : vector<8x128xi1>, vector<8x128xf32>
      %c0_32 = arith.constant 0 : index
      %c0_33 = arith.constant 0 : index
      %c0_34 = arith.constant 0 : index
      %87 = vector.load %arg4[%c0_32, %c0_33, %c0_34] : memref<1x8x128xf32, #tpu.memory_space<vmem>>, vector<1x8x128xf32>
      %88 = vector.shape_cast %87 : vector<1x8x128xf32> to vector<8x128xf32>
      %89 = vector.shape_cast %86 : vector<8x128xf32> to vector<1x8x128xf32>
      tpu.vector_store %arg4[%c0_32, %c0_33, %c0_34], %89 {strides = array<i32>} : memref<1x8x128xf32, #tpu.memory_space<vmem>>, vector<1x8x128xf32>,
    } else {
    }
    return
  }
  func.func @transform_0(%arg0: i32, %arg1: i32) -> (i32, i32) {
    %c0_i32 = arith.constant 0 : i32
    return %arg0, %arg1 : i32, i32
  }
  func.func @transform_1(%arg0: i32, %arg1: i32) -> (i32, i32) {
    %c0_i32 = arith.constant 0 : i32
    return %arg0, %arg1 : i32, i32
  }
  func.func @transform_2(%arg0: i32, %arg1: i32) -> (i32, i32, i32) {
    %c0_i32 = arith.constant 0 : i32
    %c0_i32_0 = arith.constant 0 : i32
    %c0_i32_1 = arith.constant 0 : i32
    return %arg0, %c0_i32, %c0_i32_0 : i32, i32, i32
  }
}

</mosaic_0001>

<bundles_post_ra>
// kernel: tpu_custom_call.1
= control target key start
LH: loop header
LB: loop body
LE: loop exit
PB: predicated region body
PF: predicated region fallthrough
CT: control target
= control target key end

     0   :  { %7 = vsyncpa [#allocation4], 0  ;;  %s329_s0 = inlined_call_operand.hbm [shape: f32[6,256], index: 0, kind: input, shape index: {}]   ;;  %s330_s1 = inlined_call_operand.hbm [shape: f32[6,256], index: 1, kind: input, shape index: {}]   ;;  %s331_s2 = inlined_call_operand.hbm [shape: f32[1,8,128], index: 2, kind: output, shape index: {}]  }
   0x1   :  { %8 = vsyncpa [#allocation7], 0 }
   0x2   :  { %9 = vsyncpa [#allocation5], 0  ;;  %s274_s9 = smov [#allocation3]   ;;  %s275_s11 = smov [#allocation6]  }
   0x3   :  { %s16_s10 = sshll.u32 %s274_s9, 4  ;;  %s26_s12 = sshll.u32 %s275_s11, 4  ;;  %s17_s10 = int_to_ptr.vmem [resolvable:$true] %s16_s10  ;;  %s27_s12 = int_to_ptr.vmem [resolvable:$true] %s26_s12 }
   0x4   :  { %s202_s15 = scalar_lea.hbm %s329_s0, 256 }
   0x5   :  { %p203_p0 = scmp.ne.s32.totalorder %s329_s0, %s202_s15  ;;  %p206_p1 = scmp.lt.u32.totalorder %s202_s15, %s329_s0 }
   0x7   :  { %p208_p2 = pnand %p206_p1, %p203_p0 }
   0x9   :  { %211 = shalt.err (!%p208_p2)
}
   0xa   :  { %s212_s20 = scalar_lea.vmem %s17_s10, 256  ;;  %p217_p4 = scmp.lt.s32.totalorder %s17_s10, %s17_s10 }
   0xb   :  { %p213_p3 = scmp.ne.s32.totalorder %s17_s10, %s212_s20  ;;  %p218_p5 = scmp.lt.s32.totalorder %s212_s20, %s212_s20 }
   0xd   :  { %p219_p6 = por %p218_p5, %p217_p4 }
   0xf   :  { %p220_p7 = pnand %p219_p6, %p213_p3 }
  0x11   :  { %223 = shalt.err (!%p220_p7)
}
  0x12   :  { %19 = dma.hbm_to_vmem [thread:$0]  %s329_s0, 256, %s17_s10, [#allocation4]  }
  0x13   :  { %s224_s25 = scalar_lea.hbm %s330_s1, 256 }
  0x14   :  { %p225_p8 = scmp.ne.s32.totalorder %s330_s1, %s224_s25  ;;  %p228_p9 = scmp.lt.u32.totalorder %s224_s25, %s330_s1 }
  0x16   :  { %p230_p10 = pnand %p228_p9, %p225_p8 }
  0x18   :  { %233 = shalt.err (!%p230_p10)
}
  0x19   :  { %s234_s30 = scalar_lea.vmem %s27_s12, 256  ;;  %p239_p12 = scmp.lt.s32.totalorder %s27_s12, %s27_s12 }
  0x1a   :  { %p235_p11 = scmp.ne.s32.totalorder %s27_s12, %s234_s30  ;;  %p240_p13 = scmp.lt.s32.totalorder %s234_s30, %s234_s30 }
  0x1c   :  { %p241_p0 = por %p240_p13, %p239_p12 }
  0x1e   :  { %p242_p1 = pnand %p241_p0, %p235_p11 }
  0x20   :  { %245 = shalt.err (!%p242_p1)
}
  0x21   :  { %29 = dma.hbm_to_vmem [thread:$0]  %s330_s1, 256, %s27_s12, [#allocation7]  }
  0x22   :  { %268 = dma.done.wait [#allocation4], 256  }
  0x23   :  { %269 = vsyncadd [#allocation4], 4294967040 }
  0x24   :  { %270 = dma.done.wait [#allocation7], 256  }
  0x25   :  { %271 = vsyncadd [#allocation7], 4294967040  ;;  %v44_v0 = vld [vmem:[#allocation3] sm:$0x3f]  ;;  %v45_v1 = vld [vmem:[#allocation3 + $0x8] sm:$0x3f] }
  0x26   :  { %v176_v2 = vclamps-f32 %v44_v0, 15.0  ;;  %v177_v3 = vclamps-f32 %v45_v1, 15.0  ;;  %v46_v12 = vld [vmem:[#allocation6] sm:$0x3f]  ;;  %v47_v13 = vld [vmem:[#allocation6 + $0x8] sm:$0x3f] }
  0x27   :  { %v94_v17 = vsub.f32 1.0, %v46_v12  ;;  %v95_v20 = vsub.f32 1.0, %v47_v13  ;;  %vm82_vm0 = vcmp.eq.f32.partialorder %v46_v12, 1.0  ;;  %vm83_vm1 = vcmp.eq.f32.partialorder %v47_v13, 1.0  ;;  %s277_s4 = smov [#allocation8]  }
  0x28   :  { %v52_v4 = vsub.f32 0.0, %v176_v2  ;;  %v53_v5 = vsub.f32 0.0, %v177_v3  ;;  %vm108_vm2 = vcmask 1045504   ;;  %v276_v54 = vmov 0.0   ;;  %s166_s5 = sshll.u32 %s277_s4, 4  ;;  %s167_s5 = int_to_ptr.vmem [resolvable:$true] %s166_s5 }
  0x29   :  { %v96_v29 = vmul.f32 %v94_v17, %v94_v17  ;;  %v97_v33 = vmul.f32 %v95_v20, %v95_v20  ;;  %v178_v55 = vsel %vm82_vm0, 1.0, %v276_v54  ;;  %v179_v56 = vsel %vm83_vm1, 1.0, %v276_v54  ;;  %s246_s7 = scalar_lea.vmem %s167_s5, 128  ;;  %p251_p3 = scmp.lt.s32.totalorder %s167_s5, %s167_s5 }
  0x2a   :  { %v54_v6 = vmul.f32 1.442695, %v52_v4  ;;  %v56_v7 = vmul.f32 1.442695, %v53_v5  ;;  %v121_v61 = vsel %vm108_vm2, %v178_v55, 0.0  ;;  %v122_v62 = vsel %vm108_vm2, %v179_v56, 0.0  ;;  %p247_p2 = scmp.ne.s32.totalorder %s167_s5, %s246_s7  ;;  %p252_p4 = scmp.lt.s32.totalorder %s246_s7, %s246_s7 }
  0x2b   :  { %v98_v44 = vmul.f32 %v96_v29, %v96_v29  ;;  %v99_v47 = vmul.f32 %v97_v33, %v97_v33  ;;  %v123_v0 = vadd.f32 %v122_v62, %v121_v61 }
  0x2c   :  { %190 = vpow2.f32 %v54_v6  ;;  %p253_p5 = por %p252_p4, %p251_p3 }
  0x2d   :  { %192 = vpow2.f32 %v56_v7 }
  0x2e   :  { %p254_p6 = pnand %p253_p5, %p247_p2 }
  0x36   :  { %v191_v8 = vpop.eup %190 }
  0x37   :  { %v193_v9 = vpop.eup %192  ;;  %v58_v10 = vadd.f32 1.0, %v191_v8 }
  0x38   :  { %v59_v11 = vadd.f32 1.0, %v193_v9 }
  0x39   :  { %194 = vrcp.f32 %v58_v10 }
  0x3a   :  { %196 = vrcp.f32 %v59_v11 }
  0x3b   :  { %198 = vlog2.f32 %v58_v10 }
  0x3c   :  { %200 = vlog2.f32 %v59_v11 }
  0x43   :  { %v195_v14 = vpop.eup %194 }
  0x44   :  { %v197_v15 = vpop.eup %196  ;;  %v62_v16 = vmax.f32 %v195_v14, 0.0001 }
  0x45   :  { %v199_v18 = vpop.eup %198  ;;  %v63_v19 = vmax.f32 %v197_v15, 0.0001  ;;  %v144_v15 = vlaneseq }
  0x46   :  { %v201_v21 = vpop.eup %200  ;;  %v64_v22 = vmin.f32 %v62_v16, 0.9999  ;;  %v67_v23 = vmul.f32 0.6931472, %v199_v18 }
  0x47   :  { %v65_v24 = vmin.f32 %v63_v19, 0.9999  ;;  %v69_v25 = vmul.f32 0.6931472, %v201_v21  ;;  %v145_v16 = vshrl.u32 %v144_v15, 7  ;;  %v147_v17 = vand.u32 127, %v144_v15 }
  0x48   :  { %v70_v26 = vsub.f32 0.0, %v67_v23  ;;  %v76_v27 = vsub.f32 %v52_v4, %v67_v23  ;;  %v84_v28 = vsub.f32 1.0, %v64_v22  ;;  %v90_v37 = vmul.f32 %v64_v22, %v64_v22 }
  0x49   :  { %v71_v30 = vsub.f32 0.0, %v69_v25  ;;  %v77_v31 = vsub.f32 %v53_v5, %v69_v25  ;;  %v85_v32 = vsub.f32 1.0, %v65_v24  ;;  %v91_v41 = vmul.f32 %v65_v24, %v65_v24 }
  0x4a   :  { %v72_v34 = vmax.f32 %v70_v26, -9.2103405  ;;  %v78_v35 = vmax.f32 %v76_v27, -9.2103405  ;;  %v86_v36 = vmul.f32 %v84_v28, %v84_v28  ;;  %vm148_vm3 = vcmp.eq.s32.totalorder %v145_v16, 0 }
  0x4b   :  { %v73_v38 = vmax.f32 %v71_v30, -9.2103405  ;;  %v79_v39 = vmax.f32 %v77_v31, -9.2103405  ;;  %v87_v40 = vmul.f32 %v85_v32, %v85_v32  ;;  %vm149_vm4 = vcmp.eq.s32.totalorder %v147_v17, 0 }
  0x4c   :  { %v74_v42 = vmin.f32 %v72_v34, -0.000100005  ;;  %v80_v43 = vmin.f32 %v78_v35, -0.000100005  ;;  %vm154_vm5 = vcmp.eq.s32.totalorder %v147_v17, 1  ;;  %vm150_vm6 = vmand %vm148_vm3, %vm149_vm4 }
  0x4d   :  { %v75_v45 = vmin.f32 %v73_v38, -0.000100005  ;;  %v81_v46 = vmin.f32 %v79_v39, -0.000100005  ;;  %vm155_vm7 = vmand %vm148_vm3, %vm154_vm5 }
  0x4e   :  { %v88_v48 = vmul.f32 %v86_v36, %v74_v42  ;;  %v92_v49 = vmul.f32 %v90_v37, %v80_v43 }
  0x4f   :  { %v89_v50 = vmul.f32 %v87_v40, %v75_v45  ;;  %v93_v51 = vmul.f32 %v91_v41, %v81_v46 }
  0x50   :  { %v100_v52 = vmul.f32 %v98_v44, %v92_v49 }
  0x51   :  { %v101_v53 = vmul.f32 %v99_v47, %v93_v51 }
  0x52   :  { %v102_v57 = vsel %vm82_vm0, %v88_v48, %v100_v52 }
  0x53   :  { %v103_v58 = vsel %vm83_vm1, %v89_v50, %v101_v53  ;;  %v109_v59 = vsel %vm108_vm2, %v102_v57, 0.0 }
  0x54   :  { %v110_v60 = vsel %vm108_vm2, %v103_v58, 0.0 }
  0x55   :  { %v111_v63 = vadd.f32 %v110_v60, %v109_v59 }
  0x57   :  { %112 = vadd.xlane.f32.xlu0 %v111_v63 }
  0x5b   :  { %124 = vadd.xlane.f32.xlu0 %v123_v0 }
  0xe4   :  { %v113_v1 = vpop.xlane.xlu0 %112 }
  0xe5   :  { %v114_v2 = vrot.slane %v113_v1, 4 }
  0xe7   :  { %v115_v3 = vadd.f32 %v114_v2, %v113_v1 }
  0xe8   :  { %v125_v4 = vpop.xlane.xlu0 %124 }
  0xe9   :  { %v116_v5 = vrot.slane %v115_v3, 2  ;;  %v126_v6 = vrot.slane %v125_v4, 4 }
  0xeb   :  { %v127_v7 = vadd.f32 %v126_v6, %v125_v4  ;;  %v117_v8 = vadd.f32 %v116_v5, %v115_v3 }
  0xed   :  { %v128_v9 = vrot.slane %v127_v7, 2  ;;  %v118_v10 = vrot.slane %v117_v8, 1 }
  0xef   :  { %v129_v11 = vadd.f32 %v128_v9, %v127_v7  ;;  %v119_v12 = vadd.f32 %v118_v10, %v117_v8 }
  0xf1   :  { %182 = vpush %v119_v12  ;;  %v130_v13 = vrot.slane %v129_v11, 1 }
  0xf3   :  { %v131_v14 = vadd.f32 %v130_v13, %v129_v11 }
  0xf5   :  { %184 = vpush %v131_v14 }
 0x122   :  { %s183_s1 = spop %182 }
 0x123   :  { %v152_v18 = vstv %s183_s1 }
 0x124   :  { %v153_v19 = vsel %vm150_vm6, %v152_v18, 0.0 }
 0x126   :  { %s185_s6 = spop %184 }
 0x127   :  { %v157_v20 = vstv %s185_s6 }
 0x128   :  { %v158_v21 = vsel %vm155_vm7, %v157_v20, %v153_v19 }
 0x129   :  { %159 = vst [vmem:[#allocation8] sm:$0xff] %v158_v21 }
 0x12a   :  { %257 = shalt.err (!%p254_p6)
}
 0x12b   :  { %s258_s10 = scalar_lea.hbm %s331_s2, 128 }
 0x12c   :  { %p259_p7 = scmp.ne.s32.totalorder %s331_s2, %s258_s10  ;;  %p262_p8 = scmp.lt.u32.totalorder %s258_s10, %s331_s2 }
 0x12e   :  { %p264_p9 = pnand %p262_p8, %p259_p7 }
 0x130   :  { %267 = shalt.err (!%p264_p9)
}
 0x131   :  { %169 = dma.vmem_to_hbm [thread:$0]  %s167_s5, 128, %s331_s2, [#allocation5]  }
 0x132   :  { %272 = dma.done.wait [#allocation5], 128  }
 0x133   :  { %273 = vsyncadd [#allocation5], 4294967168 }
 0x134   :  { %173 = vsyncpa [#allocation4], 1 }
 0x135   :  { %174 = vsyncpa [#allocation7], 1 }
 0x136   :  { %175 = vsyncpa [#allocation5], 1 }

</bundles_post_ra>
